<compile_context>
chip_gen: v5e
topology: v5e:2x2
jax: 0.10.0
libtpu: 0.0.40
codegen_flags: <defaults>
</compile_context>

<pallas_src>
import functools

import jax
import jax.numpy as jnp
from jax.experimental import pallas as pl
from jax.experimental.pallas import tpu as pltpu


def _round_up(v, m):
    return ((v + m - 1) // m) * m


def _cdiv(a, b):
    return (a + b - 1) // b


def gmlvq_kernel(x_ref, wt_ref, opt_ref, pnorm_ref, d_ref):
    """One N-tile of squared Euclidean distances in the omega-projected space.

    x_ref     : [TM, F]        sample tile (compute dtype, e.g. bf16)
    wt_ref    : [F, D_pad]     W^T (resident across grid steps)
    opt_ref   : [D_pad, P_pad] omega(protos)^T (resident)
    pnorm_ref : [1, P_pad]     precomputed ||omega(p_j)||^2, f32 (resident)
    d_ref     : [TM, P_pad]    output distances tile (caller dtype)
    """
    # ox = omega(x) for this tile: bf16 x bf16 -> f32 accumulate on the MXU.
    ox = jnp.dot(x_ref[...], wt_ref[...],
                 preferred_element_type=jnp.float32)              # [TM, D] f32
    # ||omega(x_i)||^2 in f32 (padded D columns are exactly zero).
    xnorm = jnp.sum(ox * ox, axis=-1, keepdims=True)              # [TM, 1]
    # Cross term on the MXU; feed it bf16, accumulate f32.
    cross = jnp.dot(ox.astype(opt_ref.dtype), opt_ref[...],
                    preferred_element_type=jnp.float32)           # [TM, P]
    d = xnorm + pnorm_ref[...] - 2.0 * cross                      # f32 epilogue
    # Clamp: the expansion can produce tiny negatives via cancellation.
    d_ref[...] = jnp.maximum(d, 0.0).astype(d_ref.dtype)


@functools.partial(jax.jit, static_argnames=("tm", "compute_dtype"))
def gmlvq_forward(x, omega_weight, prototypes, prototype_labels, *,
                  tm=512, compute_dtype=jnp.bfloat16):
    """Pallas wrapper for FastGmlvq.forward.

    Returns (distances [N, P], prototype_labels [P]) like the PyTorch module.
    tm guidance: ~256 on v5e, 512-1024 on v6e, 256-512 on v7x.
    """
    n, f = x.shape
    p_count = prototypes.shape[0]
    d_out = omega_weight.shape[0]
    out_dtype = x.dtype
    cbytes = jnp.dtype(compute_dtype).itemsize
    obytes = jnp.dtype(out_dtype).itemsize

    # ---- prototype-side precompute (tiny; f32 + highest precision) --------
    w32 = omega_weight.astype(jnp.float32)
    op = jnp.dot(prototypes.astype(jnp.float32), w32.T,
                 precision=jax.lax.Precision.HIGHEST)             # [P, D]
    pnorm = jnp.sum(op * op, axis=-1)                             # [P] f32

    # Pad only the small, grid-invariant operands: D (contraction of the 2nd
    # matmul) and P (output lane dim) to multiples of 128.  Zero padding is
    # exact.  x itself is NOT padded or copied.
    d_pad = _round_up(d_out, 128)
    p_pad = _round_up(p_count, 128)

    wt = jnp.zeros((f, d_pad), compute_dtype).at[:, :d_out].set(
        w32.T.astype(compute_dtype))
    opt = jnp.zeros((d_pad, p_pad), compute_dtype).at[:d_out, :p_count].set(
        op.T.astype(compute_dtype))
    pnorm_p = jnp.zeros((1, p_pad), jnp.float32).at[0, :p_count].set(pnorm)

    # Cast x once in the wrapper: halves the streamed DMA bytes and feeds the
    # MXU its native bf16 operands (accumulation stays f32 in the kernel).
    xc = x.astype(compute_dtype)

    # ---- balanced N tiling (edge blocks, no round-up padding of x) --------
    min_tile = 8
    if n <= min_tile:
        num_tiles, tm_eff = 1, n                      # full-extent block
    else:
        num_tiles = _cdiv(n, tm)
        if num_tiles < 2 and n >= 2 * min_tile:
            num_tiles = 2                             # let v7x's 2 TCs split
        tm_eff = _round_up(_cdiv(n, num_tiles), min_tile)
        tm_eff = min(tm_eff, n)
        num_tiles = _cdiv(n, tm_eff)

    # ---- VMEM budget: double-buffered x/out tiles + resident operands -----
    footprint = (2 * tm_eff * f * cbytes              # x tiles
                 + 2 * tm_eff * p_pad * obytes        # out tiles
                 + 2 * f * d_pad * cbytes             # W^T
                 + 2 * d_pad * p_pad * cbytes         # op^T
                 + 2 * 8 * p_pad * 4                  # pnorm (sublane-padded)
                 + tm_eff * d_pad * 4                 # ox intermediate
                 + tm_eff * p_pad * 4)                # cross intermediate
    vmem_limit = int(min(100 * 1024 * 1024,
                         max(32 * 1024 * 1024, 2 * footprint)))

    dists_padded = pl.pallas_call(
        gmlvq_kernel,
        out_shape=jax.ShapeDtypeStruct((n, p_pad), out_dtype),
        grid=(num_tiles,),
        in_specs=[
            # x streams over the grid (double-buffered by Pallas); block
            # covers the full feature dim so no wrapper-side padding of x.
            pl.BlockSpec((tm_eff, f), lambda i: (i, 0)),
            # Grid-invariant operands: same block every step -> resident.
            pl.BlockSpec((f, d_pad), lambda i: (0, 0)),
            pl.BlockSpec((d_pad, p_pad), lambda i: (0, 0)),
            pl.BlockSpec((1, p_pad), lambda i: (0, 0)),
        ],
        out_specs=pl.BlockSpec((tm_eff, p_pad), lambda i: (i, 0)),
        compiler_params=pltpu.CompilerParams(
            dimension_semantics=("parallel",),
            vmem_limit_bytes=vmem_limit,
        ),
    )(xc, wt, opt, pnorm_p)

    dists = dists_padded if p_pad == p_count else dists_padded[:, :p_count]
    return dists, prototype_labels


def _reference_forward(x, omega_weight, prototypes):
    hi = jax.lax.Precision.HIGHEST
    ox = jnp.dot(x, omega_weight.T, precision=hi)
    op = jnp.dot(prototypes, omega_weight.T, precision=hi)
    diff = ox[:, None, :] - op[None, :, :]
    return jnp.sum(diff * diff, axis=-1)


if __name__ == "__main__":
    # Small deterministic problem consistent with the module:
    #   n_samples = 16, n_features = 64, n_classes = 4, prototypes_per_class = 2
    key = jax.random.PRNGKey(0)
    k_x, k_w, k_p = jax.random.split(key, 3)

    n_samples, n_features = 16, 64
    n_classes, protos_per_class = 4, 2
    n_prototypes = n_classes * protos_per_class

    x = jax.random.normal(k_x, (n_samples, n_features), dtype=jnp.float32)
    # fit() starts omega at identity; perturb so the projection is non-trivial.
    omega_weight = (jnp.eye(n_features, dtype=jnp.float32)
                    + 0.1 * jax.random.normal(k_w, (n_features, n_features),
                                              dtype=jnp.float32))
    prototypes = 0.5 * jax.random.normal(
        k_p, (n_prototypes, n_features), dtype=jnp.float32)
    prototype_labels = jnp.repeat(jnp.arange(n_classes, dtype=jnp.int32),
                                  protos_per_class)

    ref = _reference_forward(x, omega_weight, prototypes)

    # f32 compute path: matches the reference to fp32-matmul rounding.
    d32, labels = gmlvq_forward(x, omega_weight, prototypes, prototype_labels,
                                compute_dtype=jnp.float32)
    d32 = jax.block_until_ready(d32)
    assert d32.shape == (n_samples, n_prototypes)
    assert labels.shape == (n_prototypes,)
    assert jnp.allclose(d32, ref, rtol=1e-3, atol=1e-2)

    # Default bf16-MXU path (f32 accumulation): bf16-level tolerance.
    dbf, _ = gmlvq_forward(x, omega_weight, prototypes, prototype_labels)
    dbf = jax.block_until_ready(dbf)
    assert dbf.shape == (n_samples, n_prototypes)
    assert jnp.allclose(dbf, ref, rtol=2e-2, atol=0.5)

    print("KERNEL_OK")
</pallas_src>

<mosaic_0001>
module attributes {stable_mosaic.version = 11 : i64} {
  func.func @gmlvq_kernel(%arg0: i32, %arg1: memref<8x64xf32, #tpu.memory_space<vmem>>, %arg2: memref<64x128xf32, #tpu.memory_space<vmem>>, %arg3: memref<128x128xf32, #tpu.memory_space<vmem>>, %arg4: memref<1x128xf32, #tpu.memory_space<vmem>>, %arg5: memref<8x128xf32, #tpu.memory_space<vmem>>) attributes {dimension_semantics = [#tpu.dimension_semantics<parallel>], iteration_bounds = array<i64: 2>, scalar_prefetch = 0 : i64, scratch_operands = 0 : i64, tpu.core_type = #tpu.core_type<tc>, window_params = [{transform_indices = @transform_0, window_bounds = array<i64: 8, 64>}, {pipeline_mode = #tpu.pipeline_mode<synchronous>, transform_indices = @transform_1, window_bounds = array<i64: 64, 128>}, {pipeline_mode = #tpu.pipeline_mode<synchronous>, transform_indices = @transform_2, window_bounds = array<i64: 128, 128>}, {pipeline_mode = #tpu.pipeline_mode<synchronous>, transform_indices = @transform_3, window_bounds = array<i64: 1, 128>}, {transform_indices = @transform_4, window_bounds = array<i64: 8, 128>}]} {
    %c0 = arith.constant 0 : index
    %c0_0 = arith.constant 0 : index
    %0 = vector.load %arg1[%c0, %c0_0] : memref<8x64xf32, #tpu.memory_space<vmem>>, vector<8x64xf32>
    %c0_1 = arith.constant 0 : index
    %c0_2 = arith.constant 0 : index
    %1 = vector.load %arg2[%c0_1, %c0_2] : memref<64x128xf32, #tpu.memory_space<vmem>>, vector<64x128xf32>
    %cst = arith.constant dense<0.000000e+00> : vector<8x128xf32>
    %2 = tpu.matmul %0, %1, %cst {dimension_numbers = #tpu.dot_dimension_numbers<[1], [0], [0], [1], [0, 0, 1, 1], [], []>} : vector<8x64xf32>, vector<64x128xf32>, vector<8x128xf32> -> vector<8x128xf32>
    %3 = arith.mulf %2, %2 : vector<8x128xf32>
    %cst_3 = arith.constant dense<0.000000e+00> : vector<8xf32>
    %4 = vector.multi_reduction <add>, %3, %cst_3 [1] : vector<8x128xf32> to vector<8xf32>
    %5 = vector.shape_cast %4 : vector<8xf32> to vector<8x1xf32>
    %c0_4 = arith.constant 0 : index
    %c0_5 = arith.constant 0 : index
    %6 = vector.load %arg3[%c0_4, %c0_5] : memref<128x128xf32, #tpu.memory_space<vmem>>, vector<128x128xf32>
    %cst_6 = arith.constant dense<0.000000e+00> : vector<8x128xf32>
    %7 = tpu.matmul %2, %6, %cst_6 {dimension_numbers = #tpu.dot_dimension_numbers<[1], [0], [0], [1], [0, 0, 1, 1], [], []>} : vector<8x128xf32>, vector<128x128xf32>, vector<8x128xf32> -> vector<8x128xf32>
    %c0_7 = arith.constant 0 : index
    %c0_8 = arith.constant 0 : index
    %8 = vector.load %arg4[%c0_7, %c0_8] : memref<1x128xf32, #tpu.memory_space<vmem>>, vector<1x128xf32>
    %9 = vector.broadcast %5 : vector<8x1xf32> to vector<8x128xf32>
    %10 = vector.broadcast %8 : vector<1x128xf32> to vector<8x128xf32>
    %11 = arith.addf %9, %10 : vector<8x128xf32>
    %cst_9 = arith.constant 2.000000e+00 : f32
    %12 = vector.broadcast %cst_9 : f32 to vector<8x128xf32>
    %13 = arith.mulf %12, %7 : vector<8x128xf32>
    %14 = arith.subf %11, %13 : vector<8x128xf32>
    %cst_10 = arith.constant 0.000000e+00 : f32
    %15 = vector.broadcast %cst_10 : f32 to vector<8x128xf32>
    %16 = arith.maximumf %14, %15 : vector<8x128xf32>
    %c0_11 = arith.constant 0 : index
    %c0_12 = arith.constant 0 : index
    %17 = vector.load %arg5[%c0_11, %c0_12] : memref<8x128xf32, #tpu.memory_space<vmem>>, vector<8x128xf32>
    tpu.vector_store %arg5[%c0_11, %c0_12], %16 {strides = array<i32>} : memref<8x128xf32, #tpu.memory_space<vmem>>, vector<8x128xf32>,
    return
  }
  func.func @transform_0(%arg0: i32) -> (i32, i32) {
    %c0_i32 = arith.constant 0 : i32
    %c0_i32_0 = arith.constant 0 : i32
    return %arg0, %c0_i32 : i32, i32
  }
  func.func @transform_1(%arg0: i32) -> (i32, i32) {
    %c0_i32 = arith.constant 0 : i32
    %c0_i32_0 = arith.constant 0 : i32
    %c0_i32_1 = arith.constant 0 : i32
    return %c0_i32, %c0_i32_0 : i32, i32
  }
  func.func @transform_2(%arg0: i32) -> (i32, i32) {
    %c0_i32 = arith.constant 0 : i32
    %c0_i32_0 = arith.constant 0 : i32
    %c0_i32_1 = arith.constant 0 : i32
    return %c0_i32, %c0_i32_0 : i32, i32
  }
  func.func @transform_3(%arg0: i32) -> (i32, i32) {
    %c0_i32 = arith.constant 0 : i32
    %c0_i32_0 = arith.constant 0 : i32
    %c0_i32_1 = arith.constant 0 : i32
    return %c0_i32, %c0_i32_0 : i32, i32
  }
  func.func @transform_4(%arg0: i32) -> (i32, i32) {
    %c0_i32 = arith.constant 0 : i32
    %c0_i32_0 = arith.constant 0 : i32
    return %arg0, %c0_i32 : i32, i32
  }
}

</mosaic_0001>

<bundles_post_ra>
// kernel: gmlvq_forward.1
= control target key start
LH: loop header
LB: loop body
LE: loop exit
PB: predicated region body
PF: predicated region fallthrough
CT: control target
= control target key end

     0   :  { %s379_s15 = smov 0   ;;  %s478_s0 = inlined_call_operand.vmem [shape: f32[16,64], index: 0, kind: input, shape index: {}]   ;;  %s479_s1 = inlined_call_operand.vmem [shape: f32[64,128], index: 1, kind: input, shape index: {}]   ;;  %s480_s2 = inlined_call_operand.vmem [shape: f32[128,128], index: 2, kind: input, shape index: {}]   ;;  %s481_s3 = inlined_call_operand.vmem [shape: f32[1,128], index: 3, kind: input, shape index: {}]   ;;  %s482_s4 = inlined_call_operand.vmem [shape: f32[16,128], index: 4, kind: output, shape index: {}]  }
   0x1 LB: > { %s327_s16 = sadd.s32 4294967295, %s352_s15   ;;  %p331_p0 = scmp.ge.s32.totalorder %s352_s15, 1  ;;  %s352_s15 = sphi %s379_s15, %s14_s15  }
   0x2   : > { %p161_p1 = scmp.lt.s32.totalorder %s352_s15, 3 }
   0x4   : > { %p162_p2 = pnand %p331_p0, %p161_p1 }
   0x5   : > { %p185_p3 = scmp.lt.s32.totalorder (!%p162_p2), %s327_s16, 1 }
   0x6   : > { %165 = sbr.rel (%p162_p2) target bundleno = 286 (0x11e), region = 36 }
   0xb   : > { %v201_v0 = vld [vmem:[%s479_s1 + $0x38] sm:$0xff]  ;;  %v200_v1 = vld [vmem:[%s479_s1 + $0x30] sm:$0xff]  ;;  %v199_v2 = vld [vmem:[%s479_s1 + $0x28] sm:$0xff]  ;;  %s484_s16 = smov (!%p185_p3, %s327_s16), 1  ;;  %vm202_vm0 = vcmask 523264  }
   0xc   : > { %214 = vmatpush.msra.mxu0 %v201_v0  ;;  %v244_v3 = vld [vmem:[%s480_s2 + $0x78] sm:$0xff]  ;;  %v243_v4 = vld [vmem:[%s480_s2 + $0x70] sm:$0xff]  ;;  %v198_v5 = vld [vmem:[%s479_s1 + $0x20] sm:$0xff]  ;;  %s332_s9 = sshll.u32 %s484_s16, 3 }
   0xd   : > { %245 = vmatpush.msra.mxu1 %v244_v3  ;;  %v242_v6 = vld [vmem:[%s480_s2 + $0x68] sm:$0xff]  ;;  %v197_v7 = vld [vmem:[%s479_s1 + $0x18] sm:$0xff]  ;;  %v241_v8 = vld [vmem:[%s480_s2 + $0x60] sm:$0xff]  ;;  %s188_s20 = scalar_lea.vmem %s478_s0, %s332_s9  ;;  %s192_s26 = scalar_lea.vmem %s482_s4, %s332_s9 }
   0xe   : > { %215 = vmatpush.msra.mxu0 %v200_v1  ;;  %v196_v9 = vld [vmem:[%s479_s1 + $0x10] sm:$0xff]  ;;  %v240_v10 = vld [vmem:[%s480_s2 + $0x58] sm:$0xff]  ;;  %v195_v11 = vld [vmem:[%s479_s1 + $0x8] sm:$0xff] }
   0xf   : > { %246 = vmatpush.msra.mxu1 %v243_v4  ;;  %v239_v12 = vld [vmem:[%s480_s2 + $0x50] sm:$0xff]  ;;  %v194_v13 = vld [vmem:[%s479_s1] sm:$0xff]  ;;  %v238_v14 = vld [vmem:[%s480_s2 + $0x48] sm:$0xff] }
  0x10   : > { %216 = vmatpush.msra.mxu0 %v199_v2  ;;  %v193_v15 = vld [vmem:[%s188_s20] sm:$0xff]  ;;  %v236_v17 = vld [vmem:[%s480_s2 + $0x38] sm:$0xff]  ;;  %v235_v18 = vld [vmem:[%s480_s2 + $0x30] sm:$0xff] }
  0x11   : > { %247 = vmatpush.msra.mxu1 %v242_v6  ;;  %v237_v16 = vld [vmem:[%s480_s2 + $0x40] sm:$0xff]  ;;  %v234_v19 = vld [vmem:[%s480_s2 + $0x28] sm:$0xff]  ;;  %v232_v21 = vld [vmem:[%s480_s2 + $0x18] sm:$0xff] }
  0x12   : > { %217 = vmatpush.msra.mxu0 %v198_v5  ;;  %v233_v20 = vld [vmem:[%s480_s2 + $0x20] sm:$0xff]  ;;  %v231_v22 = vld [vmem:[%s480_s2 + $0x10] sm:$0xff]  ;;  %v230_v23 = vld [vmem:[%s480_s2 + $0x8] sm:$0xff] }
  0x13   : > { %248 = vmatpush.msra.mxu1 %v241_v8  ;;  %v229_v24 = vld [vmem:[%s480_s2] sm:$0xff] }
  0x14   : > { %218 = vmatpush.msra.mxu0 %v197_v7  ;;  %v345_v27 = vld [vmem:[%s481_s3] ss:$0 sm:$0xff] }
  0x15   : > { %249 = vmatpush.msra.mxu1 %v240_v10 }
  0x16   : > { %219 = vmatpush.msra.mxu0 %v196_v9 }
  0x17   : > { %250 = vmatpush.msra.mxu1 %v239_v12 }
  0x18   : > { %220 = vmatpush.msra.mxu0 %v195_v11 }
  0x19   : > { %251 = vmatpush.msra.mxu1 %v238_v14 }
  0x1a   : > { %221 = vmatpush.msra.mxu0 %v194_v13 }
  0x1b   : > { %334 = vmatmul.msk.f32.vlgmr.msra.gmra.mxu0 %vm202_vm0, %v193_v15  ;;  %252 = vmatpush.msra.mxu1 %v237_v16 }
  0x1d   : > { %253 = vmatpush.msra.mxu1 %v236_v17 }
  0x1f   : > { %254 = vmatpush.msra.mxu1 %v235_v18 }
  0x21   : > { %255 = vmatpush.msra.mxu1 %v234_v19 }
  0x23   : > { %256 = vmatpush.msra.mxu1 %v233_v20 }
  0x25   : > { %257 = vmatpush.msra.mxu1 %v232_v21 }
  0x27   : > { %258 = vmatpush.msra.mxu1 %v231_v22 }
  0x29   : > { %259 = vmatpush.msra.mxu1 %v230_v23 }
  0x2b   : > { %260 = vmatpush.msra.mxu1 %v229_v24 }
  0x98   : > { %v223_v25 = vpop.f32.mrf.mxu0 }
  0x99   : > { %261 = vmatmul.f32.vlgmr.msra.gmra.mxu1 %v223_v25  ;;  %v226_v26 = vmul.f32 %v223_v25, %v223_v25 }
  0x9b   : > { %227 = vadd.xlane.f32.xlu0 %v226_v26 }
 0x10e   : > { %v228_v28 = vpop.xlane.xlu0 %227 }
 0x10f   : > { %v269_v30 = vadd.f32 %v345_v27, %v228_v28 }
 0x116   : > { %v262_v29 = vpop.f32.mrf.mxu1 }
 0x117   : > { %v270_v31 = vmul.f32 2.0, %v262_v29 }
 0x119   : > { %v271_v32 = vsub.f32 %v269_v30, %v270_v31 }
 0x11b   : > { %v272_v33 = vmax.f32 %v271_v32, 0.0 }
 0x11d   : > { %273 = vst [vmem:[%s192_s26] sm:$0xff] %v272_v33 }
 0x11e PF: > { %s14_s15 = sadd.s32 1, %s352_s15  }
 0x11f   : > { %p11_p4 = scmp.ge.s32.totalorder %s14_s15, 4  }
 0x121   :  { %13 = sbr.rel (!%p11_p4) target bundleno = 1 (0x1), region = 66 }

</bundles_post_ra>
